<compile_context>
chip_gen: v5e
topology: v5e:2x2
jax: 0.10.0
libtpu: 0.0.40
codegen_flags: <defaults>
</compile_context>

<pallas_src>
import functools

import jax
import jax.numpy as jnp
from jax.experimental import pallas as pl
from jax.experimental.pallas import tpu as pltpu

_LANE = 128


def _singlehead_kernel(x_ref, w1_ref, b1_ref, w2_ref, b2_ref, o_ref, *, inv_hw):
    # x_ref: (TN, F, HW) bf16 -- native NCHW layout with spatial flattened onto
    # the lane axis. Global average pool over spatial in f32 -> (TN, F); the
    # result lands with F on lanes, exactly what the matmul wants.
    feat = jnp.sum(x_ref[...].astype(jnp.float32), axis=-1) * inv_hw

    # head_fc[0]: Linear(F, F). Weights stored as (in, out) == torch W^T.
    h = jnp.dot(feat.astype(jnp.bfloat16), w1_ref[...],
                preferred_element_type=jnp.float32) + b1_ref[...]

    # head_fc[1]: Swish == x * sigmoid(x)  (f32; v5e VPU/EUP have no bf16 path).
    h = h * jax.nn.sigmoid(h)

    # head_fc[2]: Dropout(0.3) -- inference semantics (identity).
    # TODO(synk): training-mode dropout RNG not implemented.

    # head_fc[3]: Linear(F, out_dim); out padded to 128 lanes for dense stores.
    o_ref[...] = jnp.dot(h.astype(jnp.bfloat16), w2_ref[...],
                         preferred_element_type=jnp.float32) + b2_ref[...]


def single_head_model_forward(x_nchw, w1, b1, w2, b2, *, batch_tile=8):
    """x_nchw: (N, F, H, W) pre-pool backbone feature map (float32)."""
    assert batch_tile % 8 == 0, "batch tile must be sublane-aligned (multiple of 8)"
    n, f, hh, ww = x_nchw.shape
    hw = hh * ww
    out_dim = w2.shape[1]
    out_pad = ((out_dim + _LANE - 1) // _LANE) * _LANE

    tn = batch_tile
    n_pad = ((n + tn - 1) // tn) * tn

    # Glue (cheap, no transpose): flatten spatial, cast activations/weights to
    # bf16 so HBM holds half the bytes; pad batch to the tile and out_dim to 128.
    x = x_nchw.reshape(n, f, hw).astype(jnp.bfloat16)
    if n_pad != n:
        x = jnp.pad(x, ((0, n_pad - n), (0, 0), (0, 0)))
    w1_bf = w1.astype(jnp.bfloat16)
    w2_bf = jnp.pad(w2, ((0, 0), (0, out_pad - out_dim))).astype(jnp.bfloat16)
    b2_p = jnp.pad(b2, ((0, 0), (0, out_pad - out_dim)))

    grid = (n_pad // tn,)

    # VMEM budget: double-buffered x tile + resident weights/biases + out tiles.
    vmem_bytes = (
        2 * tn * f * hw * 2                       # x tile, bf16, double-buffered
        + w1_bf.size * 2 + b1.size * 4            # resident w1 / b1
        + w2_bf.size * 2 + b2_p.size * 4          # resident w2 / b2 (padded)
        + 2 * tn * out_pad * 4                    # out tile, f32, double-buffered
        + (8 << 20)                               # headroom
    )
    vmem_limit = int(min(vmem_bytes, 64 << 20))   # never exceed v7x per-TC VMEM

    cost = pl.CostEstimate(
        flops=2 * n_pad * f * hw + 2 * n_pad * f * f + 2 * n_pad * f * out_pad,
        transcendentals=n_pad * f,                # sigmoid in Swish
        bytes_accessed=(x.size * 2 + w1_bf.size * 2 + b1.size * 4
                        + w2_bf.size * 2 + b2_p.size * 4 + n_pad * out_pad * 4),
    )

    out = pl.pallas_call(
        functools.partial(_singlehead_kernel, inv_hw=1.0 / hw),
        out_shape=jax.ShapeDtypeStruct((n_pad, out_pad), jnp.float32),
        grid_spec=pltpu.PrefetchScalarGridSpec(
            num_scalar_prefetch=0,
            grid=grid,
            in_specs=[
                pl.BlockSpec((tn, f, hw), lambda i: (i, 0, 0)),   # x tile (pipelined)
                pl.BlockSpec((f, f), lambda i: (0, 0)),           # w1 (VMEM-resident)
                pl.BlockSpec((1, f), lambda i: (0, 0)),           # b1 (resident)
                pl.BlockSpec((f, out_pad), lambda i: (0, 0)),     # w2 (resident)
                pl.BlockSpec((1, out_pad), lambda i: (0, 0)),     # b2 (resident)
            ],
            out_specs=pl.BlockSpec((tn, out_pad), lambda i: (i, 0)),
        ),
        compiler_params=pltpu.CompilerParams(
            dimension_semantics=("parallel",),
            vmem_limit_bytes=vmem_limit,
        ),
        cost_estimate=cost,
    )(x, w1_bf, b1, w2_bf, b2_p)

    return out[:n, :out_dim]


def init_params(key, in_features, out_dim):
    """Deterministic torch.nn.Linear-style init, weights stored as (in, out)."""
    k1, k2, k3, k4 = jax.random.split(key, 4)
    bound1 = 1.0 / jnp.sqrt(in_features)
    w1 = jax.random.uniform(k1, (in_features, in_features), jnp.float32, -bound1, bound1)
    b1 = jax.random.uniform(k2, (1, in_features), jnp.float32, -bound1, bound1)
    w2 = jax.random.uniform(k3, (in_features, out_dim), jnp.float32, -bound1, bound1)
    b2 = jax.random.uniform(k4, (1, out_dim), jnp.float32, -bound1, bound1)
    return w1, b1, w2, b2


def reference_forward(x_nchw, w1, b1, w2, b2):
    feat = jnp.mean(x_nchw, axis=(2, 3))          # GAP over H, W -> (N, F)
    h = feat @ w1 + b1
    h = h * jax.nn.sigmoid(h)
    return h @ w2 + b2


if __name__ == "__main__":
    # Small synthetic shapes: batch=16 (to exercise a 2-step grid with tile 8),
    # num_features=64 (stand-in for resnet200d's 2048), spatial 8x8 pre-pool
    # feature map, out_dim=11.
    N, F, H, W = 16, 64, 8, 8
    OUT_DIM = 11

    key = jax.random.PRNGKey(0)
    kx, kp = jax.random.split(key)
    x = jax.random.normal(kx, (N, F, H, W), jnp.float32)
    w1, b1, w2, b2 = init_params(kp, F, OUT_DIM)

    out = single_head_model_forward(x, w1, b1, w2, b2, batch_tile=8)
    out = jax.block_until_ready(out)

    ref = reference_forward(x, w1, b1, w2, b2)
    assert out.shape == (N, OUT_DIM)
    # bf16 activations/weights with f32 accumulation: loosened tolerance.
    assert jnp.allclose(out, ref, atol=1e-2, rtol=1e-2), "mismatch vs reference"

    print("KERNEL_OK")
</pallas_src>

<mosaic_0001>
module attributes {stable_mosaic.version = 11 : i64} {
  func.func @_singlehead_kernel(%arg0: i32, %arg1: memref<8x64x64xbf16, #tpu.memory_space<vmem>>, %arg2: memref<64x64xbf16, #tpu.memory_space<vmem>>, %arg3: memref<1x64xf32, #tpu.memory_space<vmem>>, %arg4: memref<64x128xbf16, #tpu.memory_space<vmem>>, %arg5: memref<1x128xf32, #tpu.memory_space<vmem>>, %arg6: memref<8x128xf32, #tpu.memory_space<vmem>>) attributes {dimension_semantics = [#tpu.dimension_semantics<parallel>], iteration_bounds = array<i64: 2>, scalar_prefetch = 0 : i64, scratch_operands = 0 : i64, tpu.core_type = #tpu.core_type<tc>, window_params = [{transform_indices = @transform_0, window_bounds = array<i64: 8, 64, 64>}, {pipeline_mode = #tpu.pipeline_mode<synchronous>, transform_indices = @transform_1, window_bounds = array<i64: 64, 64>}, {pipeline_mode = #tpu.pipeline_mode<synchronous>, transform_indices = @transform_2, window_bounds = array<i64: 1, 64>}, {pipeline_mode = #tpu.pipeline_mode<synchronous>, transform_indices = @transform_3, window_bounds = array<i64: 64, 128>}, {pipeline_mode = #tpu.pipeline_mode<synchronous>, transform_indices = @transform_4, window_bounds = array<i64: 1, 128>}, {transform_indices = @transform_5, window_bounds = array<i64: 8, 128>}]} {
    %c0 = arith.constant 0 : index
    %c0_0 = arith.constant 0 : index
    %c0_1 = arith.constant 0 : index
    %0 = vector.load %arg1[%c0, %c0_0, %c0_1] : memref<8x64x64xbf16, #tpu.memory_space<vmem>>, vector<8x64x64xbf16>
    %1 = arith.extf %0 : vector<8x64x64xbf16> to vector<8x64x64xf32>
    %cst = arith.constant dense<0.000000e+00> : vector<8x64xf32>
    %2 = vector.multi_reduction <add>, %1, %cst [2] : vector<8x64x64xf32> to vector<8x64xf32>
    %cst_2 = arith.constant 1.562500e-02 : f32
    %3 = vector.broadcast %cst_2 : f32 to vector<8x64xf32>
    %4 = arith.mulf %2, %3 : vector<8x64xf32>
    %5 = arith.truncf %4 : vector<8x64xf32> to vector<8x64xbf16>
    %c0_3 = arith.constant 0 : index
    %c0_4 = arith.constant 0 : index
    %6 = vector.load %arg2[%c0_3, %c0_4] : memref<64x64xbf16, #tpu.memory_space<vmem>>, vector<64x64xbf16>
    %cst_5 = arith.constant dense<0.000000e+00> : vector<8x64xf32>
    %7 = tpu.matmul %5, %6, %cst_5 {dimension_numbers = #tpu.dot_dimension_numbers<[1], [0], [0], [1], [0, 0, 1, 1], [], []>} : vector<8x64xbf16>, vector<64x64xbf16>, vector<8x64xf32> -> vector<8x64xf32>
    %c0_6 = arith.constant 0 : index
    %c0_7 = arith.constant 0 : index
    %8 = vector.load %arg3[%c0_6, %c0_7] : memref<1x64xf32, #tpu.memory_space<vmem>>, vector<1x64xf32>
    %9 = vector.broadcast %8 : vector<1x64xf32> to vector<8x64xf32>
    %10 = arith.addf %7, %9 : vector<8x64xf32>
    %11 = arith.negf %10 : vector<8x64xf32>
    %12 = math.exp %11 : vector<8x64xf32>
    %cst_8 = arith.constant 1.000000e+00 : f32
    %13 = vector.broadcast %cst_8 : f32 to vector<8x64xf32>
    %14 = arith.addf %13, %12 : vector<8x64xf32>
    %15 = arith.divf %13, %14 : vector<8x64xf32>
    %16 = arith.mulf %10, %15 : vector<8x64xf32>
    %17 = arith.truncf %16 : vector<8x64xf32> to vector<8x64xbf16>
    %c0_9 = arith.constant 0 : index
    %c0_10 = arith.constant 0 : index
    %18 = vector.load %arg4[%c0_9, %c0_10] : memref<64x128xbf16, #tpu.memory_space<vmem>>, vector<64x128xbf16>
    %cst_11 = arith.constant dense<0.000000e+00> : vector<8x128xf32>
    %19 = tpu.matmul %17, %18, %cst_11 {dimension_numbers = #tpu.dot_dimension_numbers<[1], [0], [0], [1], [0, 0, 1, 1], [], []>} : vector<8x64xbf16>, vector<64x128xbf16>, vector<8x128xf32> -> vector<8x128xf32>
    %c0_12 = arith.constant 0 : index
    %c0_13 = arith.constant 0 : index
    %20 = vector.load %arg5[%c0_12, %c0_13] : memref<1x128xf32, #tpu.memory_space<vmem>>, vector<1x128xf32>
    %21 = vector.broadcast %20 : vector<1x128xf32> to vector<8x128xf32>
    %22 = arith.addf %19, %21 : vector<8x128xf32>
    %c0_14 = arith.constant 0 : index
    %c0_15 = arith.constant 0 : index
    %23 = vector.load %arg6[%c0_14, %c0_15] : memref<8x128xf32, #tpu.memory_space<vmem>>, vector<8x128xf32>
    tpu.vector_store %arg6[%c0_14, %c0_15], %22 {strides = array<i32>} : memref<8x128xf32, #tpu.memory_space<vmem>>, vector<8x128xf32>,
    return
  }
  func.func @transform_0(%arg0: i32) -> (i32, i32, i32) {
    %c0_i32 = arith.constant 0 : i32
    %c0_i32_0 = arith.constant 0 : i32
    %c0_i32_1 = arith.constant 0 : i32
    return %arg0, %c0_i32, %c0_i32_0 : i32, i32, i32
  }
  func.func @transform_1(%arg0: i32) -> (i32, i32) {
    %c0_i32 = arith.constant 0 : i32
    %c0_i32_0 = arith.constant 0 : i32
    %c0_i32_1 = arith.constant 0 : i32
    return %c0_i32, %c0_i32_0 : i32, i32
  }
  func.func @transform_2(%arg0: i32) -> (i32, i32) {
    %c0_i32 = arith.constant 0 : i32
    %c0_i32_0 = arith.constant 0 : i32
    %c0_i32_1 = arith.constant 0 : i32
    return %c0_i32, %c0_i32_0 : i32, i32
  }
  func.func @transform_3(%arg0: i32) -> (i32, i32) {
    %c0_i32 = arith.constant 0 : i32
    %c0_i32_0 = arith.constant 0 : i32
    %c0_i32_1 = arith.constant 0 : i32
    return %c0_i32, %c0_i32_0 : i32, i32
  }
  func.func @transform_4(%arg0: i32) -> (i32, i32) {
    %c0_i32 = arith.constant 0 : i32
    %c0_i32_0 = arith.constant 0 : i32
    %c0_i32_1 = arith.constant 0 : i32
    return %c0_i32, %c0_i32_0 : i32, i32
  }
  func.func @transform_5(%arg0: i32) -> (i32, i32) {
    %c0_i32 = arith.constant 0 : i32
    %c0_i32_0 = arith.constant 0 : i32
    return %arg0, %c0_i32 : i32, i32
  }
}

</mosaic_0001>

<bundles_post_ra>
// kernel: tpu_custom_call.1
= control target key start
LH: loop header
LB: loop body
LE: loop exit
PB: predicated region body
PF: predicated region fallthrough
CT: control target
= control target key end

     0   :  { %10 = vsyncpa [#allocation3], 0  ;;  %s2099_s0 = inlined_call_operand.hbm [shape: bf16[16,64,64], index: 0, kind: input, shape index: {}]   ;;  %s2100_s1 = inlined_call_operand.hbm [shape: bf16[64,64], index: 1, kind: input, shape index: {}]   ;;  %s2101_s2 = inlined_call_operand.vmem [shape: f32[1,64], index: 2, kind: input, shape index: {}]   ;;  %s2102_s3 = inlined_call_operand.hbm [shape: bf16[64,128], index: 3, kind: input, shape index: {}]   ;;  %s2103_s4 = inlined_call_operand.vmem [shape: f32[1,128], index: 4, kind: input, shape index: {}]   ;;  %s2104_s5 = inlined_call_operand.hbm [shape: f32[16,128], index: 5, kind: output, shape index: {}]  }
   0x1   :  { %12 = vsyncpa [#allocation3 + $0x1], 0 }
   0x2   :  { %13 = vsyncpa [#allocation6], 0 }
   0x3   :  { %14 = vsyncpa [#allocation4], 0 }
   0x4   :  { %16 = vsyncpa [#allocation4 + $0x1], 0  ;;  %s1669_s18 = smov 0   ;;  %s1671_s19 = smov 0  }
   0x5   :  { %s1673_s20 = smov 0   ;;  %s1675_s21 = smov 0  }
   0x6 LB: > { %s1690_s22 = sadd.s32 4294967295, %s1633_s21   ;;  %s1176_s23 = sadd.s32 4294967294, %s1633_s21   ;;  %s1633_s21 = sphi %s1675_s21, %s2116_s21   ;;  %s1629_s20 = sphi %s1673_s20, %s2115_s20   ;;  %s1625_s19 = sphi %s1671_s19, %s2114_s19   ;;  %s1621_s18 = sphi %s1669_s18, %s2113_s18  }
   0x7   : > { %p42_p0 = scmp.ne.s32.totalorder %s1625_s19, %s1621_s18  ;;  %p43_p1 = scmp.eq.s32.totalorder %s1690_s22, 0 }
   0x8   : > { %p150_p2 = scmp.eq.s32.totalorder %s1690_s22, 1  ;;  %p156_p3 = scmp.eq.s32.totalorder %s1176_s23, 1 }
   0x9   : > { %p1699_p4 = por %p43_p1, %p42_p0  ;;  %p1177_p5 = scmp.ge.s32.totalorder %s1633_s21, 1 }
   0xa   : > { %p1704_p6 = por %p156_p3, %p42_p0  ;;  %p163_p7 = scmp.lt.s32.totalorder %s1633_s21, 3 }
   0xb   : > { %s174_s28 = sshll.u32 %s2100_s1, 4  ;;  %s1635_s30 = smov [#allocation5]   ;;  %s175_s28 = int_to_ptr.hbm [resolvable:$true] %s174_s28 }
   0xc   : > { %p1712_p8 = pnand %p1177_p5, %p163_p7  ;;  %s176_s6 = sshll.u32 %s1635_s30, 4  ;;  %s177_s6 = int_to_ptr.vmem [resolvable:$true] %s176_s6 }
   0xd   : > { %s191_s9 = sshll.u32 %s2102_s3, 4  ;;  %s2105_s10 = smov 64   ;;  %s192_s9 = int_to_ptr.hbm [resolvable:$true] %s191_s9 }
   0xe   : > { %p1410_p9 = pneg %p1712_p8  ;;  %s1637_s11 = smov 4  }
   0xf   : > { %s1638_s12 = smov [#allocation7]   ;;  %s1731_s14 = sadd.s32 1, %s1633_s21  }
  0x10   : > { %p1411_p10 = pnand %p1410_p9, %p43_p1  ;;  %s193_s13 = sshll.u32 %s1638_s12, 4  ;;  %s194_s13 = int_to_ptr.vmem [resolvable:$true] %s193_s13 }
  0x11   : > { %s29_s15 = sadd.s32 1, %s1629_s20  ;;  %s26_s16 = ssub.s32 %s1633_s21, %s1731_s14 }
  0x12   : > { %1413 = dma.hbm_to_vmem [thread:$0]  (!%p1411_p10), %s175_s28, 512, %s177_s6, [#allocation6], %s2105_s10, %s2105_s10, %s1637_s11  }
  0x13   : > { %1416 = dma.hbm_to_vmem [thread:$0]  (!%p1411_p10), %s192_s9, 512, %s194_s13, [#allocation6], %s2105_s10, %s2105_s10, %s1637_s11  }
  0x14   : > { %p36_p12 = scmp.ne.s32.totalorder %s1629_s20, %s1625_s19  ;;  %p27_p13 = scmp.eq.s32.totalorder %s26_s16, 0 }
  0x15   : > { %p37_p0 = scmp.eq.s32.totalorder %s1633_s21, 0  ;;  %p1427_p5 = scmp.lt.s32.totalorder %s1633_s21, 2 }
  0x16   : > { %p1741_p3 = por %p150_p2, %p36_p12  ;;  %s210_s26 = sand.u32 1, %s1629_s20  }
  0x17   : > { %s1747_s23 = scalar_select %p27_p13, %s1629_s20, %s29_s15  }
  0x18   : > { %p38_p7 = por %p37_p0, %p36_p12  ;;  %s1181_s27 = sshll.u32 %s210_s26, 8 }
  0x19   : > { %s1230_s28 = sshll.u32 %s1633_s21, 8  ;;  %s214_s8 = scalar_lea.vmem [#allocation2], %s1181_s27 }
  0x1a   : > { %s220_s7 = scalar_lea.hbm %s2099_s0, %s1230_s28  ;;  %s223_s9 = sshll.u32 %s214_s8, 4  ;;  %s224_s9 = int_to_ptr.vmem [resolvable:$true] %s223_s9 }
  0x1b   : > { %s221_s12 = sshll.u32 %s220_s7, 4  ;;  %p1754_p2 = pnand %p1427_p5, %p38_p7  ;;  %s222_s12 = int_to_ptr.hbm [resolvable:$true] %s221_s12 }
  0x1c   : > { %s211_s15 = scalar_lea.sflag [#allocation3], %s210_s26  ;;  %s1533_s16 = sshra.s32 %s222_s12, 4  ;;  %s1534_s16 = int_to_ptr.hbm [resolvable:$true] %s1533_s16 }
  0x1d   : > { %s1535_s10 = scalar_lea.hbm %s1534_s16, 256  ;;  %p1537_p10 = pneg %p1754_p2 }
  0x1e   : > { %p1536_p9 = scmp.ne.s32.totalorder %s1534_s16, %s1535_s10  ;;  %s1540_s30 = scalar_lea.hbm %s2099_s0, 512 }
  0x1f   : > { %p1541_p0 = scmp.lt.s32.totalorder %s1534_s16, %s2099_s0  ;;  %p1542_p5 = scmp.lt.s32.totalorder %s1540_s30, %s1535_s10 }
  0x20   : > { %p1538_p12 = pnand %p1537_p10, %p1536_p9 }
  0x21   : > { %p1543_p7 = por %p1542_p5, %p1541_p0 }
  0x22   : > { %p1539_p13 = pneg %p1538_p12 }
  0x24   : > { %p1544_p11 = pnand %p1543_p7, %p1539_p13 }
  0x26   : > { %1547 = shalt.err (!%p1544_p11)
}
  0x27   : > { %s2111_s26 = smov 64   ;;  %235 = sbr.rel (%p1712_p8) target bundleno = 643 (0x283), region = 40 }
  0x28   : > { %1420 = dma.hbm_to_vmem [thread:$0]  (!%p1754_p2), %s222_s12, 4096, %s224_s9, %s211_s15, %s2111_s26, %s2111_s26, %s1637_s11  }
  0x29   : > { %s1774_s8 = sand.u32 (!%p1712_p8), 1, %s1625_s19  }
  0x2a   : > { %s1186_s16 = sshll.u32 (!%p1712_p8), %s1774_s8, 8  ;;  %s238_s10 = scalar_lea.sflag (!%p1712_p8), [#allocation3], %s1774_s8 }
  0x2b   : > { %s1778_s28 = scalar_lea.vmem (!%p1712_p8), [#allocation2], %s1186_s16 }
  0x2c   : > { %1608 = dma.done.wait (%p1699_p4), %s238_s10, 4096  }
  0x2d   : > { %1610 = vsyncadd (%p1699_p4), %s238_s10, 4294963200 }
  0x2e   : > { %1612 = dma.done.wait (%p43_p1), [#allocation6], 1024  }
  0x2f   : > { %1614 = vsyncadd (%p43_p1), [#allocation6], 4294966272  ;;  %v1370_v0 = vld [vmem:[%s1778_s28 + $0x20] sm:$0xff]   ;;  %vm409_vm0 = vcmask 523264   ;;  %v1367_v1 = vld [vmem:[%s1778_s28 + $0x8] sm:$0xff]   ;;  %vm811_vm1 = vcmask 130112  }
  0x30   : > { %v1240_v2 = vld [vmem:[%s1778_s28] sm:$0xff]   ;;  %v1257_v3 = vunpack.c.l.bf16 %v1370_v0  ;;  %v1245_v4 = vunpack.c.l.bf16 %v1367_v1  ;;  %v1258_v9 = vunpack.c.h.bf16 %v1370_v0  ;;  %v1246_v10 = vunpack.c.h.bf16 %v1367_v1  ;;  %v1371_v15 = vld [vmem:[%s1778_s28 + $0x28] sm:$0xff]   ;;  %v1368_v31 = vld [vmem:[%s1778_s28 + $0x10] sm:$0xff]   ;;  %s1226_s11 = sshll.u32 %s1690_s22, 3  ;;  %s1189_s9 = sshll.u32 %s1774_s8, 3 }
  0x31   : > { %v1241_v5 = vunpack.c.l.bf16 %v1240_v2  ;;  %v1242_v11 = vunpack.c.h.bf16 %v1240_v2  ;;  %v1374_v16 = vld [vmem:[%s1778_s28 + $0x40] sm:$0xff]   ;;  %v1262_v17 = vunpack.c.h.bf16 %v1371_v15  ;;  %v1261_v19 = vunpack.c.l.bf16 %v1371_v15  ;;  %v1375_v23 = vld [vmem:[%s1778_s28 + $0x48] sm:$0xff]   ;;  %v1372_v38 = vld [vmem:[%s1778_s28 + $0x30] sm:$0xff]   ;;  %s1082_s15 = scalar_lea.hbm %s2104_s5, %s1226_s11  ;;  %s278_s6 = scalar_lea.vmem [#allocation8], %s1189_s9 }
  0x32   : > { %v434_v6 = vsel %vm409_vm0, %v1257_v3, 0.0  ;;  %v416_v7 = vsel %vm409_vm0, %v1245_v4, 0.0  ;;  %v437_v12 = vsel %vm409_vm0, %v1258_v9, 0.0  ;;  %v419_v13 = vsel %vm409_vm0, %v1246_v10, 0.0  ;;  %v1378_v30 = vld [vmem:[%s1778_s28 + $0x60] sm:$0xff]   ;;  %v1379_v45 = vld [vmem:[%s1778_s28 + $0x68] sm:$0xff]  }
  0x33   : > { %v410_v8 = vsel %vm409_vm0, %v1241_v5, 0.0  ;;  %435 = vadd.xlane.f32.xlu1 %v434_v6  ;;  %417 = vadd.xlane.f32.xlu2 %v416_v7  ;;  %v413_v14 = vsel %vm409_vm0, %v1242_v11, 0.0  ;;  %v1273_v18 = vunpack.c.l.bf16 %v1374_v16  ;;  %v443_v20 = vsel %vm409_vm0, %v1262_v17, 0.0  ;;  %v1382_v46 = vld [vmem:[%s1778_s28 + $0x80] sm:$0xff]   ;;  %v1376_v53 = vld [vmem:[%s1778_s28 + $0x50] sm:$0xff]   ;;  %v1383_v60 = vld [vmem:[%s1778_s28 + $0x88] sm:$0xff]  }
  0x34   : > { %411 = vadd.xlane.f32.xlu0 %v410_v8  ;;  %v440_v22 = vsel %vm409_vm0, %v1261_v19, 0.0  ;;  %v1277_v24 = vunpack.c.l.bf16 %v1375_v23  ;;  %v1278_v25 = vunpack.c.h.bf16 %v1375_v23  ;;  %v1274_v26 = vunpack.c.h.bf16 %v1374_v16  ;;  %v1386_v61 = vld [vmem:[%s1778_s28 + $0xa0] sm:$0xff]   ;;  %v1369_v4 = vld [vmem:[%s1778_s28 + $0x18] sm:$0xff]   ;;  %v1387_v19 = vld [vmem:[%s1778_s28 + $0xa8] sm:$0xff]   ;;  %s1084_s7 = sshll.u32 %s278_s6, 4  ;;  %s1086_s26 = sshll.u32 %s1082_s15, 4  ;;  %s1085_s7 = int_to_ptr.vmem [resolvable:$true] %s1084_s7  ;;  %s1087_s26 = int_to_ptr.hbm [resolvable:$true] %s1086_s26 }
  0x35   : > { %v458_v21 = vsel %vm409_vm0, %v1273_v18, 0.0  ;;  %v1290_v32 = vunpack.c.h.bf16 %v1378_v30  ;;  %v1249_v33 = vunpack.c.l.bf16 %v1368_v31  ;;  %v1289_v34 = vunpack.c.l.bf16 %v1378_v30  ;;  %v1373_v11 = vld [vmem:[%s1778_s28 + $0x38] sm:$0xff]   ;;  %s1072_s16 = scalar_lea.sflag [#allocation4], %s1774_s8  ;;  %s1577_s22 = sshra.s32 %s1087_s26, 4  ;;  %s1578_s22 = int_to_ptr.hbm [resolvable:$true] %s1577_s22 }
  0x36   : > { %v464_v27 = vsel %vm409_vm0, %v1277_v24, 0.0  ;;  %v467_v28 = vsel %vm409_vm0, %v1278_v25, 0.0  ;;  %v461_v29 = vsel %vm409_vm0, %v1274_v26, 0.0  ;;  %v1265_v39 = vunpack.c.l.bf16 %v1372_v38  ;;  %v1390_v26 = vld [vmem:[%s1778_s28 + $0xc0] sm:$0xff]   ;;  %s1579_s10 = scalar_lea.hbm %s1578_s22, 8  ;;  %s1583_s29 = scalar_lea.hbm %s2104_s5, 16 }
  0x37   : > { %v485_v35 = vsel %vm409_vm0, %v1290_v32, 0.0  ;;  %v422_v36 = vsel %vm409_vm0, %v1249_v33, 0.0  ;;  %v482_v37 = vsel %vm409_vm0, %v1289_v34, 0.0  ;;  %v1266_v40 = vunpack.c.h.bf16 %v1372_v38  ;;  %v1384_v34 = vld [vmem:[%s1778_s28 + $0x90] sm:$0xff]   ;;  %p1580_p1 = scmp.ne.s32.totalorder %s1578_s22, %s1579_s10  ;;  %p1584_p11 = scmp.lt.s32.totalorder %s1578_s22, %s2104_s5 }
  0x38   : > { %v1250_v41 = vunpack.c.h.bf16 %v1368_v31  ;;  %v446_v42 = vsel %vm409_vm0, %v1265_v39, 0.0  ;;  %v1294_v47 = vunpack.c.h.bf16 %v1379_v45  ;;  %v1305_v48 = vunpack.c.l.bf16 %v1382_v46  ;;  %p1585_p2 = scmp.lt.s32.totalorder %s1583_s29, %s1579_s10 }
  0x39   : > { %v449_v43 = vsel %vm409_vm0, %v1266_v40, 0.0  ;;  %v1293_v49 = vunpack.c.l.bf16 %v1379_v45  ;;  %v1281_v54 = vunpack.c.l.bf16 %v1376_v53  ;;  %v1282_v55 = vunpack.c.h.bf16 %v1376_v53  ;;  %p1581_p4 = pnand %p1580_p1, %p1741_p3 }
  0x3a   : > { %v425_v44 = vsel %vm409_vm0, %v1250_v41, 0.0  ;;  %v491_v50 = vsel %vm409_vm0, %v1294_v47, 0.0  ;;  %v506_v51 = vsel %vm409_vm0, %v1305_v48, 0.0  ;;  %v1306_v56 = vunpack.c.h.bf16 %v1382_v46  ;;  %v1391_v41 = vld [vmem:[%s1778_s28 + $0xc8] sm:$0xff]   ;;  %p1586_p9 = por %p1585_p2, %p1584_p11 }
  0x3b   : > { %438 = vadd.xlane.f32.xlu1 %v437_v12  ;;  %420 = vadd.xlane.f32.xlu2 %v419_v13  ;;  %v488_v52 = vsel %vm409_vm0, %v1293_v49, 0.0  ;;  %v470_v57 = vsel %vm409_vm0, %v1281_v54, 0.0  ;;  %v473_v58 = vsel %vm409_vm0, %v1282_v55, 0.0  ;;  %v1310_v62 = vunpack.c.h.bf16 %v1383_v60  ;;  %v1380_v12 = vld [vmem:[%s1778_s28 + $0x70] sm:$0xff]   ;;  %v1381_v49 = vld [vmem:[%s1778_s28 + $0x78] sm:$0xff]   ;;  %p1582_p8 = pneg %p1581_p4 }
  0x3c   : > { %414 = vadd.xlane.f32.xlu0 %v413_v14  ;;  %v509_v59 = vsel %vm409_vm0, %v1306_v56, 0.0  ;;  %v1321_v63 = vunpack.c.l.bf16 %v1386_v61  ;;  %v1309_v0 = vunpack.c.l.bf16 %v1383_v60  ;;  %v1253_v5 = vunpack.c.l.bf16 %v1369_v4  ;;  %v1388_v60 = vld [vmem:[%s1778_s28 + $0xb0] sm:$0xff]  }
  0x3d   : > { %v515_v1 = vsel %vm409_vm0, %v1310_v62, 0.0  ;;  %v1254_v6 = vunpack.c.h.bf16 %v1369_v4  ;;  %v1322_v7 = vunpack.c.h.bf16 %v1386_v61  ;;  %v1270_v13 = vunpack.c.h.bf16 %v1373_v11  ;;  %v1395_v61 = vld [vmem:[%s1778_s28 + $0xe8] sm:$0xff]   ;;  %p1587_p10 = pnand %p1586_p9, %p1582_p8 }
  0x3e   : > { %v530_v2 = vsel %vm409_vm0, %v1321_v63, 0.0  ;;  %v512_v3 = vsel %vm409_vm0, %v1309_v0, 0.0  ;;  %v428_v8 = vsel %vm409_vm0, %v1253_v5, 0.0  ;;  %v1297_v14 = vunpack.c.l.bf16 %v1380_v12 }
  0x3f   : > { %v431_v9 = vsel %vm409_vm0, %v1254_v6, 0.0  ;;  %v533_v10 = vsel %vm409_vm0, %v1322_v7, 0.0  ;;  %v1269_v15 = vunpack.c.l.bf16 %v1373_v11  ;;  %v455_v16 = vsel %vm409_vm0, %v1270_v13, 0.0  ;;  %v1385_v13 = vld [vmem:[%s1778_s28 + $0x98] sm:$0xff]  }
  0x40   : > { %v494_v17 = vsel %vm409_vm0, %v1297_v14, 0.0  ;;  %v1337_v30 = vunpack.c.l.bf16 %v1390_v26  ;;  %v1341_v45 = vunpack.c.l.bf16 %v1391_v41  ;;  %v1330_v62 = vunpack.c.h.bf16 %v1388_v60 }
  0x41   : > { %v452_v18 = vsel %vm409_vm0, %v1269_v15, 0.0  ;;  %v1357_v63 = vunpack.c.l.bf16 %v1395_v61  ;;  %vm815_vm2 = vcmask 195712   ;;  %vm819_vm3 = vcmask 261312  }
  0x42   : > { %v554_v33 = vsel %vm409_vm0, %v1337_v30, 0.0  ;;  %v560_v48 = vsel %vm409_vm0, %v1341_v45, 0.0  ;;  %v545_v11 = vsel %vm409_vm0, %v1330_v62, 0.0  ;;  %v1389_v45 = vld [vmem:[%s1778_s28 + $0xb8] sm:$0xff]   ;;  %vm823_vm4 = vcmask 326912  }
  0x43   : > { %444 = vadd.xlane.f32.xlu1 %v443_v20  ;;  %459 = vadd.xlane.f32.xlu2 %v458_v21  ;;  %v1325_v20 = vunpack.c.l.bf16 %v1387_v19  ;;  %v1326_v21 = vunpack.c.h.bf16 %v1387_v19  ;;  %vm827_vm5 = vcmask 392512   ;;  %vm831_vm6 = vcmask 458112  }
  0x44   : > { %441 = vadd.xlane.f32.xlu0 %v440_v22  ;;  %v1298_v22 = vunpack.c.h.bf16 %v1380_v12  ;;  %v584_v12 = vsel %vm409_vm0, %v1357_v63, 0.0  ;;  %vm835_vm7 = vcmask 523712   ;;  %vm942_vm8 = vcmask 1041409  }
  0x45   : > { %v536_v23 = vsel %vm409_vm0, %v1325_v20, 0.0  ;;  %v539_v24 = vsel %vm409_vm0, %v1326_v21, 0.0  ;;  %vm944_vm9 = vcmask 1042434   ;;  %vm946_vm10 = vcmask 1043459  }
  0x46   : > { %v497_v25 = vsel %vm409_vm0, %v1298_v22, 0.0  ;;  %v1317_v22 = vunpack.c.l.bf16 %v1385_v13  ;;  %vm948_vm11 = vcmask 1044484   ;;  %vm950_vm12 = vcmask 1045509  }
  0x47   : > { %vm952_vm13 = vcmask 1046534   ;;  %vm954_vm14 = vcmask 1047559  }
  0x4b   : > { %465 = vadd.xlane.f32.xlu1 %v464_v27  ;;  %468 = vadd.xlane.f32.xlu2 %v467_v28  ;;  %v1377_v27 = vld [vmem:[%s1778_s28 + $0x58] sm:$0xff]   ;;  %v1338_v28 = vunpack.c.h.bf16 %v1390_v26  ;;  %v1318_v26 = vunpack.c.h.bf16 %v1385_v13 }
  0x4c   : > { %462 = vadd.xlane.f32.xlu0 %v461_v29  ;;  %v1285_v29 = vunpack.c.l.bf16 %v1377_v27 }
  0x4d   : > { %v557_v31 = vsel %vm409_vm0, %v1338_v28, 0.0  ;;  %v1358_v28 = vunpack.c.h.bf16 %v1395_v61 }
  0x4e   : > { %v476_v32 = vsel %vm409_vm0, %v1285_v29, 0.0 }
  0x53   : > { %486 = vadd.xlane.f32.xlu1 %v485_v35  ;;  %423 = vadd.xlane.f32.xlu2 %v422_v36  ;;  %v1313_v35 = vunpack.c.l.bf16 %v1384_v34  ;;  %v1314_v36 = vunpack.c.h.bf16 %v1384_v34 }
  0x54   : > { %483 = vadd.xlane.f32.xlu0 %v482_v37  ;;  %v1286_v37 = vunpack.c.h.bf16 %v1377_v27 }
  0x55   : > { %v518_v38 = vsel %vm409_vm0, %v1313_v35, 0.0  ;;  %v521_v39 = vsel %vm409_vm0, %v1314_v36, 0.0 }
  0x56   : > { %v479_v40 = vsel %vm409_vm0, %v1286_v37, 0.0  ;;  %v524_v37 = vsel %vm409_vm0, %v1317_v22, 0.0 }
  0x5b   : > { %447 = vadd.xlane.f32.xlu1 %v446_v42  ;;  %450 = vadd.xlane.f32.xlu2 %v449_v43  ;;  %v1394_v42 = vld [vmem:[%s1778_s28 + $0xe0] sm:$0xff]   ;;  %v1342_v43 = vunpack.c.h.bf16 %v1391_v41  ;;  %v527_v41 = vsel %vm409_vm0, %v1318_v26, 0.0 }
  0x5c   : > { %426 = vadd.xlane.f32.xlu0 %v425_v44  ;;  %v1353_v44 = vunpack.c.l.bf16 %v1394_v42 }
  0x5d   : > { %v563_v46 = vsel %vm409_vm0, %v1342_v43, 0.0  ;;  %v587_v43 = vsel %vm409_vm0, %v1358_v28, 0.0 }
  0x5e   : > { %v578_v47 = vsel %vm409_vm0, %v1353_v44, 0.0  ;;  %v1392_v44 = vld [vmem:[%s1778_s28 + $0xd0] sm:$0xff]  }
  0x63   : > { %492 = vadd.xlane.f32.xlu1 %v491_v50  ;;  %507 = vadd.xlane.f32.xlu2 %v506_v51  ;;  %v1301_v50 = vunpack.c.l.bf16 %v1381_v49  ;;  %v1302_v51 = vunpack.c.h.bf16 %v1381_v49 }
  0x64   : > { %489 = vadd.xlane.f32.xlu0 %v488_v52  ;;  %v1354_v52 = vunpack.c.h.bf16 %v1394_v42 }
  0x65   : > { %v500_v56 = vsel %vm409_vm0, %v1301_v50, 0.0 }
  0x6b   : > { %471 = vadd.xlane.f32.xlu1 %v470_v57  ;;  %474 = vadd.xlane.f32.xlu2 %v473_v58  ;;  %v503_v57 = vsel %vm409_vm0, %v1302_v51, 0.0  ;;  %v581_v58 = vsel %vm409_vm0, %v1354_v52, 0.0  ;;  %v1346_v52 = vunpack.c.h.bf16 %v1392_v44 }
  0x6c   : > { %510 = vadd.xlane.f32.xlu0 %v509_v59  ;;  %v806_v59 = vlaneseq }
  0x73   : > { %516 = vadd.xlane.f32.xlu1 %v515_v1  ;;  %531 = vadd.xlane.f32.xlu2 %v530_v2  ;;  %v1862_v2 = vand.u32 127, %v806_v59 }
  0x74   : > { %513 = vadd.xlane.f32.xlu0 %v512_v3  ;;  %v1329_v3 = vunpack.c.l.bf16 %v1388_v60 }
  0x75   : > { %v1868_v15 = vadd.s32 4294967280, %v1862_v2  ;;  %v1875_v20 = vadd.s32 4294967272, %v1862_v2 }
  0x7b   : > { %429 = vadd.xlane.f32.xlu1 %v428_v8  ;;  %432 = vadd.xlane.f32.xlu2 %v431_v9 }
  0x7c   : > { %534 = vadd.xlane.f32.xlu0 %v533_v10 }
  0x83   : > { %456 = vadd.xlane.f32.xlu1 %v455_v16  ;;  %495 = vadd.xlane.f32.xlu2 %v494_v17  ;;  %v542_v17 = vsel %vm409_vm0, %v1329_v3, 0.0  ;;  %v569_v3 = vsel %vm409_vm0, %v1346_v52, 0.0  ;;  %v1924_v52 = vadd.s32 4294967256, %v1862_v2 }
  0x84   : > { %453 = vadd.xlane.f32.xlu0 %v452_v18  ;;  %v1872_v18 = vadd.s32 4294967288, %v1862_v2 }
  0x8b   : > { %537 = vadd.xlane.f32.xlu1 %v536_v23  ;;  %540 = vadd.xlane.f32.xlu2 %v539_v24 }
  0x8c   : > { %498 = vadd.xlane.f32.xlu0 %v497_v25 }
  0x93   : > { %558 = vadd.xlane.f32.xlu1 %v557_v31  ;;  %477 = vadd.xlane.f32.xlu2 %v476_v32 }
  0x94   : > { %555 = vadd.xlane.f32.xlu0 %v554_v33 }
  0x9b   : > { %519 = vadd.xlane.f32.xlu1 %v518_v38  ;;  %522 = vadd.xlane.f32.xlu2 %v521_v39 }
  0x9c   : > { %480 = vadd.xlane.f32.xlu0 %v479_v40 }
  0xa3   : > { %564 = vadd.xlane.f32.xlu1 %v563_v46  ;;  %579 = vadd.xlane.f32.xlu2 %v578_v47 }
  0xa4   : > { %561 = vadd.xlane.f32.xlu0 %v560_v48 }
  0xa6   : > { %v436_v53 = vpop.xlane.xlu1 %435  ;;  %v418_v54 = vpop.xlane.xlu2 %417 }
  0xa7   : > { %v412_v55 = vpop.xlane.xlu0 %411  ;;  %v610_v0 = vmul.f32 0.015625, %v436_v53  ;;  %v604_v1 = vmul.f32 0.015625, %v418_v54  ;;  %v1333_v53 = vunpack.c.l.bf16 %v1389_v45  ;;  %v1345_v54 = vunpack.c.l.bf16 %v1392_v44 }
  0xa8   : > { %v602_v9 = vmul.f32 0.015625, %v412_v55 }
  0xab   : > { %501 = vadd.xlane.f32.xlu1 %v500_v56  ;;  %504 = vadd.xlane.f32.xlu2 %v503_v57 }
  0xac   : > { %582 = vadd.xlane.f32.xlu0 %v581_v58 }
  0xae   : > { %v439_v4 = vpop.xlane.xlu1 %438  ;;  %v421_v5 = vpop.xlane.xlu2 %420 }
  0xaf   : > { %v611_v6 = vmul.f32 0.015625, %v439_v4  ;;  %v605_v7 = vmul.f32 0.015625, %v421_v5  ;;  %v415_v8 = vpop.xlane.xlu0 %414  ;;  %v548_v4 = vsel %vm409_vm0, %v1333_v53, 0.0 }
  0xb0   : > { %v603_v10 = vmul.f32 0.015625, %v415_v8  ;;  %v1396_v8 = vld [vmem:[%s1778_s28 + $0xf0] sm:$0xff]  }
  0xb1   : > { %v670_v14 = vpack.c.bf16 %v611_v6, %v610_v0  ;;  %v667_v16 = vpack.c.bf16 %v605_v7, %v604_v1  ;;  %v566_v7 = vsel %vm409_vm0, %v1345_v54, 0.0 }
  0xb2   : > { %v666_v19 = vpack.c.bf16 %v603_v10, %v602_v9 }
  0xb3   : > { %v744_v21 = vunpack.c.l.b16 %v667_v16  ;;  %546 = vadd.xlane.f32.xlu1 %v545_v11  ;;  %585 = vadd.xlane.f32.xlu2 %v584_v12  ;;  %v745_v23 = vunpack.c.h.b16 %v667_v16  ;;  %v750_v33 = vunpack.c.l.b16 %v670_v14  ;;  %v751_v34 = vunpack.c.h.b16 %v670_v14 }
  0xb4   : > { %v742_v24 = vunpack.c.l.b16 %v666_v19  ;;  %v743_v25 = vunpack.c.h.b16 %v666_v19  ;;  %543 = vadd.xlane.f32.xlu0 %v542_v17  ;;  %v1361_v14 = vunpack.c.l.bf16 %v1396_v8  ;;  %v1362_v16 = vunpack.c.h.bf16 %v1396_v8 }
  0xb5   : > { %v814_v27 = vperm.slane %v744_v21, %v1868_v15  ;;  %v818_v38 = vperm.slane %v745_v23, %v1875_v20  ;;  %v837_v48 = vperm.slane %v750_v33, %v1862_v2  ;;  %v838_v49 = vperm.slane %v751_v34, %v1872_v18  ;;  %v1393_v34 = vld [vmem:[%s1778_s28 + $0xd8] sm:$0xff]  }
  0xb6   : > { %v808_v29 = vperm.slane %v742_v24, %v1862_v2  ;;  %v810_v30 = vperm.slane %v743_v25, %v1872_v18  ;;  %v445_v31 = vpop.xlane.xlu1 %444  ;;  %v460_v32 = vpop.xlane.xlu2 %459  ;;  %v1334_v19 = vunpack.c.h.bf16 %v1389_v45 }
  0xb7   : > { %v613_v35 = vmul.f32 0.015625, %v445_v31  ;;  %v442_v36 = vpop.xlane.xlu0 %441  ;;  %v618_v55 = vmul.f32 0.015625, %v460_v32  ;;  %v839_v60 = vsel %vm811_vm1, %v838_v49, %v837_v48  ;;  %v593_v31 = vsel %vm409_vm0, %v1362_v16, 0.0 }
  0xb8   : > { %v812_v39 = vsel %vm811_vm1, %v810_v30, %v808_v29  ;;  %v612_v40 = vmul.f32 0.015625, %v442_v36  ;;  %v590_v30 = vsel %vm409_vm0, %v1361_v14, 0.0  ;;  %v551_v33 = vsel %vm409_vm0, %v1334_v19, 0.0 }
  0xb9   : > { %v816_v42 = vsel %vm815_vm2, %v814_v27, %v812_v39 }
  0xba   : > { %v671_v46 = vpack.c.bf16 %v613_v35, %v612_v40  ;;  %v1889_v47 = vsel %vm819_vm3, %v818_v38, %v816_v42  ;;  %v1397_v35 = vld [vmem:[%s1778_s28 + $0xf8] sm:$0xff]   ;;  %v1350_v38 = vunpack.c.h.bf16 %v1393_v34  ;;  %v1349_v40 = vunpack.c.l.bf16 %v1393_v34 }
  0xbb   : > { %525 = vadd.xlane.f32.xlu1 %v524_v37  ;;  %528 = vadd.xlane.f32.xlu2 %v527_v41  ;;  %v1365_v39 = vunpack.c.l.bf16 %v1397_v35 }
  0xbc   : > { %v752_v50 = vunpack.c.l.b16 %v671_v46  ;;  %v753_v51 = vunpack.c.h.b16 %v671_v46  ;;  %588 = vadd.xlane.f32.xlu0 %v587_v43  ;;  %v575_v49 = vsel %vm409_vm0, %v1350_v38, 0.0  ;;  %v572_v54 = vsel %vm409_vm0, %v1349_v40, 0.0 }
  0xbe   : > { %v840_v56 = vperm.slane %v752_v50, %v1868_v15  ;;  %v842_v57 = vperm.slane %v753_v51, %v1875_v20  ;;  %v466_v58 = vpop.xlane.xlu1 %465  ;;  %v469_v59 = vpop.xlane.xlu2 %468  ;;  %v596_v50 = vsel %vm409_vm0, %v1365_v39, 0.0  ;;  %v1921_v51 = vadd.s32 4294967264, %v1862_v2 }
  0xbf   : > { %v620_v61 = vmul.f32 0.015625, %v466_v58  ;;  %v621_v62 = vmul.f32 0.015625, %v469_v59  ;;  %v463_v63 = vpop.xlane.xlu0 %462 }
  0xc0   : > { %v841_v0 = vsel %vm815_vm2, %v840_v56, %v839_v60  ;;  %v619_v1 = vmul.f32 0.015625, %v463_v63 }
  0xc1   : > { %v1900_v5 = vsel %vm819_vm3, %v842_v57, %v841_v0  ;;  %v675_v6 = vpack.c.bf16 %v621_v62, %v620_v61  ;;  %v1366_v62 = vunpack.c.h.bf16 %v1397_v35 }
  0xc2   : > { %v674_v9 = vpack.c.bf16 %v619_v1, %v618_v55 }
  0xc3   : > { %v760_v10 = vunpack.c.l.b16 %v675_v6  ;;  %v761_v11 = vunpack.c.h.b16 %v675_v6  ;;  %570 = vadd.xlane.f32.xlu1 %v569_v3  ;;  %549 = vadd.xlane.f32.xlu2 %v548_v4  ;;  %v599_v14 = vsel %vm409_vm0, %v1366_v62, 0.0 }
  0xc4   : > { %v758_v12 = vunpack.c.l.b16 %v674_v9  ;;  %v759_v13 = vunpack.c.h.b16 %v674_v9  ;;  %567 = vadd.xlane.f32.xlu0 %v566_v7 }
  0xc5   : > { %v855_v17 = vperm.slane %v760_v10, %v1868_v15  ;;  %v857_v21 = vperm.slane %v761_v11, %v1875_v20 }
  0xc6   : > { %v852_v22 = vperm.slane %v758_v12, %v1862_v2  ;;  %v853_v23 = vperm.slane %v759_v13, %v1872_v18  ;;  %v487_v24 = vpop.xlane.xlu1 %486  ;;  %v424_v25 = vpop.xlane.xlu2 %423 }
  0xc7   : > { %v627_v26 = vmul.f32 0.015625, %v487_v24  ;;  %v484_v27 = vpop.xlane.xlu0 %483  ;;  %v606_v41 = vmul.f32 0.015625, %v424_v25 }
  0xc8   : > { %v854_v28 = vsel %vm811_vm1, %v853_v23, %v852_v22  ;;  %v626_v29 = vmul.f32 0.015625, %v484_v27 }
  0xc9   : > { %v856_v32 = vsel %vm815_vm2, %v855_v17, %v854_v28 }
  0xca   : > { %v678_v36 = vpack.c.bf16 %v627_v26, %v626_v29  ;;  %v1916_v37 = vsel %vm819_vm3, %v857_v21, %v856_v32 }
  0xcb   : > { %591 = vadd.xlane.f32.xlu1 %v590_v30  ;;  %594 = vadd.xlane.f32.xlu2 %v593_v31 }
  0xcc   : > { %552 = vadd.xlane.f32.xlu0 %v551_v33  ;;  %v766_v4 = vunpack.c.l.b16 %v678_v36  ;;  %v767_v6 = vunpack.c.h.b16 %v678_v36 }
  0xce   : > { %v448_v42 = vpop.xlane.xlu1 %447  ;;  %v451_v43 = vpop.xlane.xlu2 %450  ;;  %v867_v17 = vperm.slane %v766_v4, %v1862_v2  ;;  %v868_v19 = vperm.slane %v767_v6, %v1872_v18  ;;  %v1968_v6 = vadd.s32 4294967248, %v1862_v2 }
  0xcf   : > { %v614_v44 = vmul.f32 0.015625, %v448_v42  ;;  %v615_v45 = vmul.f32 0.015625, %v451_v43  ;;  %v427_v46 = vpop.xlane.xlu0 %426 }
  0xd0   : > { %v607_v48 = vmul.f32 0.015625, %v427_v46  ;;  %v869_v26 = vsel %vm811_vm1, %v868_v19, %v867_v17 }
  0xd1   : > { %v672_v53 = vpack.c.bf16 %v615_v45, %v614_v44 }
  0xd2   : > { %v668_v55 = vpack.c.bf16 %v607_v48, %v606_v41 }
  0xd3   : > { %v754_v56 = vunpack.c.l.b16 %v672_v53  ;;  %v755_v57 = vunpack.c.h.b16 %v672_v53  ;;  %576 = vadd.xlane.f32.xlu1 %v575_v49  ;;  %597 = vadd.xlane.f32.xlu2 %v596_v50 }
  0xd4   : > { %v746_v58 = vunpack.c.l.b16 %v668_v55  ;;  %v747_v59 = vunpack.c.h.b16 %v668_v55  ;;  %573 = vadd.xlane.f32.xlu0 %v572_v54 }
  0xd5   : > { %v844_v60 = vperm.slane %v754_v56, %v1921_v51  ;;  %v846_v61 = vperm.slane %v755_v57, %v1924_v52 }
  0xd6   : > { %v822_v63 = vperm.slane %v746_v58, %v1921_v51  ;;  %v826_v0 = vperm.slane %v747_v59, %v1924_v52  ;;  %v493_v1 = vpop.xlane.xlu1 %492  ;;  %v508_v3 = vpop.xlane.xlu2 %507 }
  0xd7   : > { %v845_v7 = vsel %vm823_vm4, %v844_v60, %v1900_v5  ;;  %v629_v8 = vmul.f32 0.015625, %v493_v1  ;;  %v490_v9 = vpop.xlane.xlu0 %489  ;;  %v634_v22 = vmul.f32 0.015625, %v508_v3 }
  0xd8   : > { %v1934_v10 = vsel %vm827_vm5, %v846_v61, %v845_v7  ;;  %v824_v11 = vsel %vm823_vm4, %v822_v63, %v1889_v47  ;;  %v628_v12 = vmul.f32 0.015625, %v490_v9  ;;  %v1971_v7 = vadd.s32 4294967240, %v1862_v2 }
  0xd9   : > { %v1939_v13 = vsel %vm827_vm5, %v826_v0, %v824_v11 }
  0xda   : > { %v679_v16 = vpack.c.bf16 %v629_v8, %v628_v12 }
  0xdc   : > { %v768_v5 = vunpack.c.l.b16 %v679_v16  ;;  %v769_v21 = vunpack.c.h.b16 %v679_v16  ;;  %600 = vadd.xlane.f32.xlu0 %v599_v14 }
  0xde   : > { %v870_v23 = vperm.slane %v768_v5, %v1868_v15  ;;  %v872_v24 = vperm.slane %v769_v21, %v1875_v20  ;;  %v472_v47 = vpop.xlane.xlu1 %471  ;;  %v475_v25 = vpop.xlane.xlu2 %474 }
  0xdf   : > { %v622_v27 = vmul.f32 0.015625, %v472_v47  ;;  %v623_v28 = vmul.f32 0.015625, %v475_v25  ;;  %v511_v29 = vpop.xlane.xlu0 %510 }
  0xe0   : > { %v871_v30 = vsel %vm815_vm2, %v870_v23, %v869_v26  ;;  %v635_v31 = vmul.f32 0.015625, %v511_v29 }
  0xe1   : > { %v1949_v32 = vsel %vm819_vm3, %v872_v24, %v871_v30  ;;  %v676_v33 = vpack.c.bf16 %v623_v28, %v622_v27 }
  0xe2   : > { %v682_v34 = vpack.c.bf16 %v635_v31, %v634_v22 }
  0xe3   : > { %v762_v35 = vunpack.c.l.b16 %v676_v33  ;;  %v763_v36 = vunpack.c.h.b16 %v676_v33 }
  0xe4   : > { %v774_v43 = vunpack.c.l.b16 %v682_v34  ;;  %v775_v44 = vunpack.c.h.b16 %v682_v34 }
  0xe5   : > { %v859_v38 = vperm.slane %v762_v35, %v1921_v51  ;;  %v861_v39 = vperm.slane %v763_v36, %v1924_v52 }
  0xe6   : > { %v517_v40 = vpop.xlane.xlu1 %516  ;;  %v532_v41 = vpop.xlane.xlu2 %531  ;;  %v882_v53 = vperm.slane %v774_v43, %v1862_v2  ;;  %v883_v54 = vperm.slane %v775_v44, %v1872_v18 }
  0xe7   : > { %v860_v42 = vsel %vm823_vm4, %v859_v38, %v1916_v37  ;;  %v637_v45 = vmul.f32 0.015625, %v517_v40  ;;  %v514_v46 = vpop.xlane.xlu0 %513  ;;  %v642_v57 = vmul.f32 0.015625, %v532_v41 }
  0xe8   : > { %v1956_v48 = vsel %vm827_vm5, %v861_v39, %v860_v42  ;;  %v636_v49 = vmul.f32 0.015625, %v514_v46  ;;  %v884_v61 = vsel %vm811_vm1, %v883_v54, %v882_v53 }
  0xea   : > { %v683_v50 = vpack.c.bf16 %v637_v45, %v636_v49 }
  0xec   : > { %v776_v55 = vunpack.c.l.b16 %v683_v50  ;;  %v777_v56 = vunpack.c.h.b16 %v683_v50 }
  0xee   : > { %v885_v58 = vperm.slane %v776_v55, %v1868_v15  ;;  %v887_v37 = vperm.slane %v777_v56, %v1875_v20  ;;  %v430_v59 = vpop.xlane.xlu1 %429  ;;  %v433_v60 = vpop.xlane.xlu2 %432 }
  0xef   : > { %v608_v62 = vmul.f32 0.015625, %v430_v59  ;;  %v609_v63 = vmul.f32 0.015625, %v433_v60  ;;  %v535_v0 = vpop.xlane.xlu0 %534 }
  0xf0   : > { %v886_v1 = vsel %vm815_vm2, %v885_v58, %v884_v61  ;;  %v643_v3 = vmul.f32 0.015625, %v535_v0 }
  0xf1   : > { %v1965_v4 = vsel %vm819_vm3, %v887_v37, %v886_v1  ;;  %v669_v8 = vpack.c.bf16 %v609_v63, %v608_v62 }
  0xf2   : > { %v686_v9 = vpack.c.bf16 %v643_v3, %v642_v57 }
  0xf3   : > { %v748_v11 = vunpack.c.l.b16 %v669_v8  ;;  %v749_v12 = vunpack.c.h.b16 %v669_v8 }
  0xf4   : > { %v782_v27 = vunpack.c.l.b16 %v686_v9  ;;  %v783_v28 = vunpack.c.h.b16 %v686_v9 }
  0xf5   : > { %v830_v14 = vperm.slane %v748_v11, %v1968_v6  ;;  %v834_v16 = vperm.slane %v749_v12, %v1971_v7 }
  0xf6   : > { %v457_v17 = vpop.xlane.xlu1 %456  ;;  %v496_v19 = vpop.xlane.xlu2 %495  ;;  %v897_v42 = vperm.slane %v782_v27, %v1862_v2  ;;  %v898_v43 = vperm.slane %v783_v28, %v1872_v18 }
  0xf7   : > { %v832_v5 = vsel %vm831_vm6, %v830_v14, %v1939_v13  ;;  %v617_v21 = vmul.f32 0.015625, %v457_v17  ;;  %v454_v22 = vpop.xlane.xlu0 %453  ;;  %v630_v29 = vmul.f32 0.015625, %v496_v19 }
  0xf8   : > { %v836_v23 = vsel %vm835_vm7, %v834_v16, %v832_v5  ;;  %v616_v24 = vmul.f32 0.015625, %v454_v22 }
  0xfa   : > { %v673_v47 = vpack.c.bf16 %v617_v21, %v616_v24 }
  0xfc   : > { %v756_v25 = vunpack.c.l.b16 %v673_v47  ;;  %v757_v26 = vunpack.c.h.b16 %v673_v47 }
  0xfe   : > { %v848_v30 = vperm.slane %v756_v25, %v1968_v6  ;;  %v850_v31 = vperm.slane %v757_v26, %v1971_v7  ;;  %v538_v33 = vpop.xlane.xlu1 %537  ;;  %v541_v34 = vpop.xlane.xlu2 %540 }
  0xff   : > { %v644_v35 = vmul.f32 0.015625, %v538_v33  ;;  %v645_v13 = vmul.f32 0.015625, %v541_v34  ;;  %v499_v36 = vpop.xlane.xlu0 %498 }
 0x100   : > { %v849_v38 = vsel %vm831_vm6, %v848_v30, %v1934_v10  ;;  %v631_v39 = vmul.f32 0.015625, %v499_v36  ;;  %v899_v10 = vsel %vm811_vm1, %v898_v43, %v897_v42  ;;  %v1234_v43 = vld [vmem:[#allocation5 + $0x18] sm:$0xff] }
 0x101   : > { %v851_v40 = vsel %vm835_vm7, %v850_v31, %v849_v38  ;;  %v687_v41 = vpack.c.bf16 %v645_v13, %v644_v35  ;;  %988 = vmatpush.bf16.msra.mxu0 %v1234_v43 }
 0x102   : > { %v943_v44 = vsel %vm942_vm8, %v851_v40, %v836_v23  ;;  %v680_v45 = vpack.c.bf16 %v631_v39, %v630_v29 }
 0x103   : > { %v784_v46 = vunpack.c.l.b16 %v687_v41  ;;  %v785_v49 = vunpack.c.h.b16 %v687_v41 }
 0x104   : > { %v770_v50 = vunpack.c.l.b16 %v680_v45  ;;  %v771_v53 = vunpack.c.h.b16 %v680_v45 }
 0x105   : > { %v900_v54 = vperm.slane %v784_v46, %v1868_v15  ;;  %v902_v55 = vperm.slane %v785_v49, %v1875_v20 }
 0x106   : > { %v874_v56 = vperm.slane %v770_v50, %v1921_v51  ;;  %v876_v57 = vperm.slane %v771_v53, %v1924_v52  ;;  %v559_v58 = vpop.xlane.xlu1 %558  ;;  %v478_v37 = vpop.xlane.xlu2 %477 }
 0x107   : > { %v901_v59 = vsel %vm815_vm2, %v900_v54, %v899_v10  ;;  %v556_v60 = vpop.xlane.xlu0 %555  ;;  %v624_v0 = vmul.f32 0.015625, %v478_v37 }
 0x108   : > { %v1992_v61 = vsel %vm819_vm3, %v902_v55, %v901_v59  ;;  %v875_v62 = vsel %vm823_vm4, %v874_v56, %v1949_v32  ;;  %v1233_v55 = vld [vmem:[#allocation5 + $0x10] sm:$0xff]  ;;  %v651_v56 = vmul.f32 0.015625, %v559_v58 }
 0x109   : > { %v877_v63 = vsel %vm827_vm5, %v876_v57, %v875_v62  ;;  %v650_v57 = vmul.f32 0.015625, %v556_v60  ;;  %989 = vmatpush.bf16.msra.mxu0 %v1233_v55 }
 0x10e   : > { %v520_v1 = vpop.xlane.xlu1 %519  ;;  %v523_v3 = vpop.xlane.xlu2 %522 }
 0x10f   : > { %v481_v8 = vpop.xlane.xlu0 %480  ;;  %v638_v29 = vmul.f32 0.015625, %v520_v1  ;;  %v639_v30 = vmul.f32 0.015625, %v523_v3  ;;  %v1232_v3 = vld [vmem:[#allocation5 + $0x8] sm:$0xff] }
 0x110   : > { %v625_v9 = vmul.f32 0.015625, %v481_v8  ;;  %990 = vmatpush.bf16.msra.mxu0 %v1232_v3 }
 0x111   : > { %v684_v13 = vpack.c.bf16 %v639_v30, %v638_v29 }
 0x112   : > { %v677_v11 = vpack.c.bf16 %v625_v9, %v624_v0 }
 0x113   : > { %v778_v42 = vunpack.c.l.b16 %v684_v13 }
 0x114   : > { %v764_v12 = vunpack.c.l.b16 %v677_v11  ;;  %v765_v14 = vunpack.c.h.b16 %v677_v11 }
 0x115   : > { %v889_v45 = vperm.slane %v778_v42, %v1921_v51 }
 0x116   : > { %v863_v16 = vperm.slane %v764_v12, %v1968_v6  ;;  %v865_v17 = vperm.slane %v765_v14, %v1971_v7  ;;  %v565_v19 = vpop.xlane.xlu1 %564  ;;  %v1999_v5 = vpop.xlane.xlu2 %579  ;;  %v690_v14 = vpack.c.bf16 %v651_v56, %v650_v57 }
 0x117   : > { %v562_v21 = vpop.xlane.xlu0 %561  ;;  %v890_v37 = vsel %vm823_vm4, %v889_v45, %v1965_v4  ;;  %v653_v8 = vmul.f32 0.015625, %v565_v19  ;;  %v1231_v4 = vld [vmem:[#allocation5] sm:$0xff]  ;;  %v658_v29 = vmul.f32 0.015625, %v1999_v5 }
 0x118   : > { %v864_v32 = vsel %vm831_vm6, %v863_v16, %v1956_v48  ;;  %v652_v9 = vmul.f32 0.015625, %v562_v21  ;;  %991 = vmatpush.bf16.msra.mxu0 %v1231_v4 }
 0x119   : > { %v866_v22 = vsel %vm835_vm7, %v865_v17, %v864_v32 }
 0x11a   : > { %v945_v23 = vsel %vm944_vm9, %v866_v22, %v943_v44  ;;  %v779_v44 = vunpack.c.h.b16 %v684_v13  ;;  %v691_v19 = vpack.c.bf16 %v653_v8, %v652_v9 }
 0x11c   : > { %v891_v59 = vperm.slane %v779_v44, %v1924_v52  ;;  %v792_v30 = vunpack.c.l.b16 %v691_v19  ;;  %v793_v44 = vunpack.c.h.b16 %v691_v19 }
 0x11e   : > { %v502_v24 = vpop.xlane.xlu1 %501  ;;  %v505_v47 = vpop.xlane.xlu2 %504  ;;  %v892_v58 = vsel %vm827_vm5, %v891_v59, %v890_v37  ;;  %v915_v45 = vperm.slane %v792_v30, %v1868_v15  ;;  %v917_v59 = vperm.slane %v793_v44, %v1875_v20 }
 0x11f   : > { %v632_v25 = vmul.f32 0.015625, %v502_v24  ;;  %v633_v26 = vmul.f32 0.015625, %v505_v47  ;;  %v583_v27 = vpop.xlane.xlu0 %582  ;;  %v790_v24 = vunpack.c.l.b16 %v690_v14  ;;  %v791_v47 = vunpack.c.h.b16 %v690_v14 }
 0x121   : > { %v681_v28 = vpack.c.bf16 %v633_v26, %v632_v25 }
 0x123   : > { %v772_v31 = vunpack.c.l.b16 %v681_v28  ;;  %v773_v33 = vunpack.c.h.b16 %v681_v28 }
 0x125   : > { %v878_v34 = vperm.slane %v772_v31, %v1968_v6  ;;  %v880_v35 = vperm.slane %v773_v33, %v1971_v7  ;;  %v659_v31 = vmul.f32 0.015625, %v583_v27  ;;  %v912_v33 = vperm.slane %v790_v24, %v1862_v2 }
 0x126   : > { %v547_v36 = vpop.xlane.xlu1 %546  ;;  %v586_v48 = vpop.xlane.xlu2 %585 }
 0x127   : > { %v879_v38 = vsel %vm831_vm6, %v878_v34, %v877_v63  ;;  %v544_v39 = vpop.xlane.xlu0 %543  ;;  %v647_v62 = vmul.f32 0.015625, %v547_v36  ;;  %v913_v34 = vperm.slane %v791_v47, %v1872_v18  ;;  %v694_v5 = vpack.c.bf16 %v659_v31, %v658_v29 }
 0x128   : > { %v881_v40 = vsel %vm835_vm7, %v880_v35, %v879_v38  ;;  %v646_v63 = vmul.f32 0.015625, %v544_v39  ;;  %v660_v35 = vmul.f32 0.015625, %v586_v48 }
 0x129   : > { %v947_v41 = vsel %vm946_vm10, %v881_v40, %v945_v23  ;;  %v914_v27 = vsel %vm811_vm1, %v913_v34, %v912_v33 }
 0x12a   : > { %v688_v16 = vpack.c.bf16 %v647_v62, %v646_v63  ;;  %v916_v37 = vsel %vm815_vm2, %v915_v45, %v914_v27  ;;  %v798_v62 = vunpack.c.l.b16 %v694_v5  ;;  %v799_v63 = vunpack.c.h.b16 %v694_v5 }
 0x12b   : > { %v918_v19 = vsel %vm819_vm3, %v917_v59, %v916_v37 }
 0x12c   : > { %v786_v25 = vunpack.c.l.b16 %v688_v16  ;;  %v787_v38 = vunpack.c.h.b16 %v688_v16 }
 0x12e   : > { %v526_v46 = vpop.xlane.xlu1 %525  ;;  %v529_v49 = vpop.xlane.xlu2 %528  ;;  %v904_v39 = vperm.slane %v786_v25, %v1921_v51 }
 0x12f   : > { %v640_v50 = vmul.f32 0.015625, %v526_v46  ;;  %v641_v53 = vmul.f32 0.015625, %v529_v49  ;;  %v589_v54 = vpop.xlane.xlu0 %588 }
 0x130   : > { %v661_v40 = vmul.f32 0.015625, %v589_v54  ;;  %v905_v48 = vsel %vm823_vm4, %v904_v39, %v1992_v61 }
 0x131   : > { %v685_v10 = vpack.c.bf16 %v641_v53, %v640_v50  ;;  %v906_v50 = vperm.slane %v787_v38, %v1924_v52 }
 0x132   : > { %v695_v53 = vpack.c.bf16 %v661_v40, %v660_v35 }
 0x133   : > { %v780_v0 = vunpack.c.l.b16 %v685_v10  ;;  %v781_v1 = vunpack.c.h.b16 %v685_v10  ;;  %v907_v61 = vsel %vm827_vm5, %v906_v50, %v905_v48 }
 0x134   : > { %v800_v8 = vunpack.c.l.b16 %v695_v53  ;;  %v801_v24 = vunpack.c.h.b16 %v695_v53 }
 0x135   : > { %v893_v11 = vperm.slane %v780_v0, %v1968_v6  ;;  %v895_v12 = vperm.slane %v781_v1, %v1971_v7 }
 0x136   : > { %v571_v60 = vpop.xlane.xlu1 %570  ;;  %v550_v32 = vpop.xlane.xlu2 %549  ;;  %v930_v47 = vperm.slane %v800_v8, %v1868_v15  ;;  %v932_v34 = vperm.slane %v801_v24, %v1875_v20 }
 0x137   : > { %v894_v17 = vsel %vm831_vm6, %v893_v11, %v892_v58  ;;  %v568_v22 = vpop.xlane.xlu0 %567  ;;  %v655_v26 = vmul.f32 0.015625, %v571_v60  ;;  %v648_v13 = vmul.f32 0.015625, %v550_v32  ;;  %v928_v32 = vperm.slane %v799_v63, %v1872_v18 }
 0x138   : > { %v896_v23 = vsel %vm835_vm7, %v895_v12, %v894_v17  ;;  %v654_v28 = vmul.f32 0.015625, %v568_v22  ;;  %v927_v17 = vperm.slane %v798_v62, %v1862_v2 }
 0x139   : > { %v949_v21 = vsel %vm948_vm11, %v896_v23, %v947_v41 }
 0x13a   : > { %v692_v41 = vpack.c.bf16 %v655_v26, %v654_v28  ;;  %v929_v33 = vsel %vm811_vm1, %v928_v32, %v927_v17 }
 0x13c   : > { %v794_v55 = vunpack.c.l.b16 %v692_v41  ;;  %v795_v9 = vunpack.c.h.b16 %v692_v41 }
 0x13e   : > { %v592_v36 = vpop.xlane.xlu1 %591  ;;  %v595_v46 = vpop.xlane.xlu2 %594  ;;  %v919_v14 = vperm.slane %v794_v55, %v1921_v51  ;;  %v921_v25 = vperm.slane %v795_v9, %v1924_v52 }
 0x13f   : > { %v553_v42 = vpop.xlane.xlu0 %552  ;;  %v662_v10 = vmul.f32 0.015625, %v592_v36  ;;  %v663_v54 = vmul.f32 0.015625, %v595_v46  ;;  %v931_v36 = vsel %vm815_vm2, %v930_v47, %v929_v33 }
 0x140   : > { %v649_v43 = vmul.f32 0.015625, %v553_v42  ;;  %v920_v28 = vsel %vm823_vm4, %v919_v14, %v918_v19  ;;  %v933_v44 = vsel %vm819_vm3, %v932_v34, %v931_v36 }
 0x141   : > { %v696_v58 = vpack.c.bf16 %v663_v54, %v662_v10  ;;  %v922_v35 = vsel %vm827_vm5, %v921_v25, %v920_v28  ;;  %v1237_v10 = vld [vmem:[#allocation7 + $0x10] sm:$0xff]  ;;  %v1236_v54 = vld [vmem:[#allocation7 + $0x8] sm:$0xff] }
 0x142   : > { %v689_v49 = vpack.c.bf16 %v649_v43, %v648_v13 }
 0x143   : > { %v802_v29 = vunpack.c.l.b16 %v696_v58  ;;  %v803_v15 = vunpack.c.h.b16 %v696_v58 }
 0x144   : > { %v788_v56 = vunpack.c.l.b16 %v689_v49  ;;  %v789_v57 = vunpack.c.h.b16 %v689_v49 }
 0x145   : > { %v934_v38 = vperm.slane %v802_v29, %v1921_v51  ;;  %v936_v20 = vperm.slane %v803_v15, %v1924_v52  ;;  %v1238_v52 = vld [vmem:[#allocation7 + $0x18] sm:$0xff] }
 0x146   : > { %v908_v0 = vperm.slane %v788_v56, %v1968_v6  ;;  %v910_v1 = vperm.slane %v789_v57, %v1971_v7  ;;  %v577_v3 = vpop.xlane.xlu1 %576  ;;  %v598_v26 = vpop.xlane.xlu2 %597  ;;  %1061 = vmatpush.bf16.msra.mxu1 %v1238_v52 }
 0x147   : > { %v657_v11 = vmul.f32 0.015625, %v577_v3  ;;  %v574_v12 = vpop.xlane.xlu0 %573  ;;  %v935_v45 = vsel %vm823_vm4, %v934_v38, %v933_v44 }
 0x148   : > { %v909_v60 = vsel %vm831_vm6, %v908_v0, %v907_v61  ;;  %v656_v4 = vmul.f32 0.015625, %v574_v12  ;;  %v937_v51 = vsel %vm827_vm5, %v936_v20, %v935_v45 }
 0x149   : > { %v911_v16 = vsel %vm835_vm7, %v910_v1, %v909_v60 }
 0x14a   : > { %v693_v22 = vpack.c.bf16 %v657_v11, %v656_v4  ;;  %v951_v23 = vsel %vm950_vm12, %v911_v16, %v949_v21  ;;  %v664_v21 = vmul.f32 0.015625, %v598_v26  ;;  %1062 = vmatpush.bf16.msra.mxu1 %v1237_v10  ;;  %v1468_v16 = vld [vmem:[%s2103_s4] ss:$0 sm:$0xff] }
 0x14c   : > { %v796_v30 = vunpack.c.l.b16 %v693_v22  ;;  %v797_v31 = vunpack.c.h.b16 %v693_v22 }
 0x14e   : > { %v923_v2 = vperm.slane %v796_v30, %v1968_v6  ;;  %v925_v18 = vperm.slane %v797_v31, %v1971_v7  ;;  %1063 = vmatpush.bf16.msra.mxu1 %v1236_v54 }
 0x14f   : > { %v601_v13 = vpop.xlane.xlu0 %600 }
 0x150   : > { %v665_v39 = vmul.f32 0.015625, %v601_v13  ;;  %v924_v40 = vsel %vm831_vm6, %v923_v2, %v922_v35 }
 0x151   : > { %v926_v41 = vsel %vm835_vm7, %v925_v18, %v924_v40 }
 0x152   : > { %v697_v42 = vpack.c.bf16 %v665_v39, %v664_v21  ;;  %v953_v43 = vsel %vm952_vm13, %v926_v41, %v951_v23 }
 0x154   : > { %v804_v5 = vunpack.c.l.b16 %v697_v42  ;;  %v805_v46 = vunpack.c.h.b16 %v697_v42 }
 0x156   : > { %v938_v27 = vperm.slane %v804_v5, %v1968_v6  ;;  %v940_v49 = vperm.slane %v805_v46, %v1971_v7  ;;  %v1467_v6 = vld [vmem:[%s2101_s2] ss:$0 sm:$0xff] }
 0x157   : > { %v1235_v7 = vld [vmem:[#allocation7] sm:$0xff] }
 0x158   : > { %v939_v48 = vsel %vm831_vm6, %v938_v27, %v937_v51  ;;  %1064 = vmatpush.bf16.msra.mxu1 %v1235_v7 }
 0x159   : > { %v941_v50 = vsel %vm835_vm7, %v940_v49, %v939_v48 }
 0x15a   : > { %v955_v53 = vsel %vm954_vm14, %v941_v50, %v953_v43 }
 0x15b   : > { %v956_v55 = vpack.c.b16 %v955_v53, %v955_v53 }
 0x15d   : > { %1206 = vmatmul.msk.bf16.vlgmr.msra.gmra.mxu0 %vm409_vm0, %v956_v55 }
 0x1da   : > { %v993_v56 = vpop.f32.mrf.mxu0 }
 0x1db   : > { %v994_v57 = vadd.f32 %v1467_v6, %v993_v56 }
 0x1dd   : > { %v1207_v37 = vmul.f32 -1.442695, %v994_v57 }
 0x1df   : > { %1469 = vpow2.f32 %v1207_v37 }
 0x1e2   : > { %v995_v59 = vpop.f32.mrf.mxu0 }
 0x1e5   : > { %v1470_v62 = vpop.eup %1469 }
 0x1e6   : > { %v1000_v63 = vadd.f32 1.0, %v1470_v62 }
 0x1e8   : > { %1471 = vrcp.f32 %v1000_v63  ;;  %v1012_v61 = vand.u32 2147483648, %v1000_v63  ;;  %v1010_v9 = vand.u32 2147483647, %v1000_v63  ;;  %vm1006_vm1 = vweird.f32 %v1000_v63 }
 0x1ea   : > { %v1013_v12 = vor.u32 1.1754944e-38, %v1012_v61  ;;  %vm1011_vm3 = vcmp.eq.f32.partialorder %v1010_v9, 8.507059e+37 }
 0x1ee   : > { %v1472_v0 = vpop.eup %1471 }
 0x1ef   : > { %v1002_v1 = vmul.f32 %v1472_v0, %v1000_v63  ;;  %vm1007_vm15 = vweird.f32 %v1472_v0 }
 0x1f0   : > { %vm1008_vm2 = vmor %vm1006_vm1, %vm1007_vm15 }
 0x1f1   : > { %v1003_v3 = vsub.f32 1.0, %v1002_v1 }
 0x1f3   : > { %v1004_v8 = vmul.f32 %v1472_v0, %v1003_v3 }
 0x1f5   : > { %v1005_v11 = vadd.f32 %v1472_v0, %v1004_v8 }
 0x1f7   : > { %v1009_v14 = vsel %vm1008_vm2, %v1472_v0, %v1005_v11 }
 0x1f8   : > { %v1014_v58 = vsel %vm1011_vm3, %v1013_v12, %v1009_v14 }
 0x1f9   : > { %v1016_v60 = vmul.f32 %v1014_v58, %v994_v57 }
 0x1fb   : > { %v1017_v4 = vpack.c.bf16 %v1016_v60, %v1016_v60 }
 0x1fd   : > { %1224 = vmatmul.msk.bf16.vlgmr.msra.gmra.mxu1 %vm409_vm0, %v1017_v4 }
 0x27a   : > { %v1066_v17 = vpop.f32.mrf.mxu1 }
 0x27b   : > { %v1067_v32 = vadd.f32 %v1468_v16, %v1066_v17 }
 0x27d   : > { %1070 = vst [vmem:[%s278_s6] sm:$0xff] %v1067_v32 }
 0x27e   : > { %1590 = shalt.err (!%p1587_p10)
}
 0x27f   : > { %1408 = dma.vmem_to_hbm [thread:$0]  (%p1741_p3), %s1085_s7, 128, %s1087_s26, %s1072_s16  }
 0x282   : > { %v1068_v22 = vpop.f32.mrf.mxu1 }
 0x283 PF: > { %s1098_s8 = sand.u32 1, %s1621_s18   ;;  %p2112_p12 = scmp.ge.s32.totalorder %s1633_s21, 2 }
 0x284   : > { %s1099_s12 = scalar_lea.sflag [#allocation4], %s1098_s8 }
 0x285   : > { %p1422_p13 = pnand %p2112_p12, %p1704_p6 }
 0x287   : > { %p1423_p0 = pneg %p1422_p13 }
 0x289   : > { %1616 = dma.done.wait (%p1423_p0), %s1099_s12, 128  }
 0x28a   : > { %1618 = vsyncadd (%p1423_p0), %s1099_s12, 4294967168  ;;  %p19_p5 = scmp.ge.s32.totalorder %s1731_s14, 4   ;;  %s2113_s18 = smov %s1625_s19 }
 0x28b   : > { %s2114_s19 = smov %s1629_s20  ;;  %s2115_s20 = smov %s1747_s23 }
 0x28c   : > { %s2116_s21 = smov %s1731_s14  ;;  %21 = sbr.rel (!%p19_p5) target bundleno = 6 (0x6), region = 93 }
 0x291   :  { %1105 = vsyncpa [#allocation3], 1 }
 0x292   :  { %1107 = vsyncpa [#allocation3 + $0x1], 1 }
 0x293   :  { %1108 = vsyncpa [#allocation6], 1 }
 0x294   :  { %1109 = vsyncpa [#allocation4], 1 }
 0x295   :  { %1111 = vsyncpa [#allocation4 + $0x1], 1 }

</bundles_post_ra>
